<compile_context>
chip_gen: v5e
topology: v5e:2x2
jax: 0.10.0
libtpu: 0.0.40
codegen_flags: <defaults>
</compile_context>

<pallas_src>
import jax
import jax.numpy as jnp
from jax.experimental import pallas as pl
from jax.experimental.pallas import tpu as pltpu


def _round_up(x, m):
    return (x + m - 1) // m * m


def _cdiv(a, b):
    return (a + b - 1) // b


def _grouped_matmul_kernel(x_ref, w_ref, o_ref, acc_ref):
    """One (group, batch, spatial-tile, K-tile) grid step.

    x_ref   : (1, 1, tK, tP)      im2col slab block, K-order = cin*T + tap
    w_ref   : (1, Cout_g, tK)     per-group weight block
    o_ref   : (1, 1, Cout_g, tP)  output block, lane-dense along tP
    acc_ref : (Cout_g, tP) f32    accumulator across the K grid axis
    """
    k = pl.program_id(3)

    @pl.when(k == 0)
    def _():
        acc_ref[...] = jnp.zeros_like(acc_ref)

    acc_ref[...] += jnp.dot(w_ref[0], x_ref[0, 0],
                            preferred_element_type=jnp.float32)

    @pl.when(k == pl.num_programs(3) - 1)
    def _():
        o_ref[0, 0] = acc_ref[...].astype(o_ref.dtype)


def conv3d_c(x_ncdhw, weight, *, stride=1, groups=1, compute_dtype=None,
             tile_p=1024, tile_k=1024):
    """Forward pass of module `C`.

    x_ncdhw : (N, Cin, D, H, W)               -- PyTorch layout
    weight  : (Cout, Cin//groups, kD, kH, kW) -- PyTorch Conv3d weight layout
    returns : (N, Cout, Do, Ho, Wo)

    tile_p: spatial tile upper bound (multiple of 128). 1024 is a good default
            for all gens; can be raised to 2048 on v5e/v6e (128 MiB VMEM) and
            should stay <=1024 on v7x (64 MiB VMEM).
    tile_k: contraction tile upper bound (rounded to a multiple of 128).
    """
    N, Cin, D, H, W = x_ncdhw.shape
    Cout, Cin_g, kD, kH, kW = weight.shape
    assert Cin_g * groups == Cin and Cout % groups == 0
    # Module C uses padding=(kSize-1)//2 which replicates PyTorch "same"
    # behaviour only for odd kernel sizes.
    assert kD % 2 == 1 and kH % 2 == 1 and kW % 2 == 1, "kSize must be odd"
    Cout_g = Cout // groups
    pad_d, pad_h, pad_w = (kD - 1) // 2, (kH - 1) // 2, (kW - 1) // 2

    Do = (D + 2 * pad_d - kD) // stride + 1
    Ho = (H + 2 * pad_h - kH) // stride + 1
    Wo = (W + 2 * pad_w - kW) // stride + 1
    P = Do * Ho * Wo
    T = kD * kH * kW
    K = T * Cin_g

    # ---- layout plumbing (plain JAX / XLA) -------------------------------
    # Pad spatial dims in NCDHW, then cast BEFORE the T-fold expansion so the
    # big im2col slab is already in the (narrow) compute dtype.
    x_p = jnp.pad(x_ncdhw, ((0, 0), (0, 0), (pad_d, pad_d),
                            (pad_h, pad_h), (pad_w, pad_w)))
    w = weight
    if compute_dtype is not None:
        x_p = x_p.astype(compute_dtype)
        w = w.astype(compute_dtype)

    Dp, Hp, Wp = x_p.shape[2:]
    xg = x_p.reshape(N, groups, Cin_g, Dp, Hp, Wp)

    # im2col: stack taps on an interior axis so (N, groups, K, P) is a single
    # reshape (no relayout of the inflated slab).  K order = cin*T + tap.
    taps = []
    for kd in range(kD):
        for kh in range(kH):
            for kw in range(kW):
                taps.append(
                    xg[:, :, :,
                       kd: kd + stride * (Do - 1) + 1: stride,
                       kh: kh + stride * (Ho - 1) + 1: stride,
                       kw: kw + stride * (Wo - 1) + 1: stride])
    pat = jnp.stack(taps, axis=3)            # (N, g, Cin_g, T, Do, Ho, Wo)
    x_col = pat.reshape(N, groups, K, P)     # (N, g, K, P)

    # (Cout, Cin_g, kD, kH, kW) -> (groups, Cout_g, K); same k-order (c*T+t).
    w = w.reshape(groups, Cout_g, K)

    # ---- tiling decisions -------------------------------------------------
    # Spatial tile: minimize P padding, full-lane stores, >=2 tiles if the
    # other parallel axes are trivial (feeds both v7x TensorCores).
    P128 = _round_up(P, 128)
    n_chunks = P128 // 128
    n_tiles = max(1, _cdiv(P128, max(128, tile_p)))
    if groups * N == 1 and n_chunks >= 2:
        n_tiles = max(n_tiles, 2)
    n_tiles = min(n_tiles, n_chunks)
    tP = 128 * _cdiv(n_chunks, n_tiles)
    P_pad = tP * n_tiles

    # Contraction tile: pad K to a multiple of 128, tile if large so VMEM
    # (x block, weight block, double buffers) stays bounded on v7x.
    K128 = _round_up(K, 128)
    tK = min(K128, _round_up(max(128, tile_k), 128))
    n_k = _cdiv(K128, tK)
    Kp = tK * n_k

    if Kp != K or P_pad != P:
        x_col = jnp.pad(x_col, ((0, 0), (0, 0), (0, Kp - K), (0, P_pad - P)))
    if Kp != K:
        w = jnp.pad(w, ((0, 0), (0, 0), (0, Kp - K)))

    out_dtype = x_ncdhw.dtype
    in_item = jnp.dtype(x_col.dtype).itemsize
    out_item = jnp.dtype(out_dtype).itemsize

    # VMEM: double-buffered x & w blocks, double-buffered out block, f32 acc.
    vmem_need = (2 * tK * tP * in_item
                 + 2 * Cout_g * tK * in_item
                 + 2 * Cout_g * tP * out_item
                 + Cout_g * tP * 4)
    vmem_limit = int(min(max(1.5 * vmem_need + (4 << 20), 16 << 20), 100 << 20))

    flops = 2 * groups * N * Cout_g * Kp * P_pad
    bytes_accessed = int(x_col.size * in_item + w.size * in_item
                         + N * groups * Cout_g * P_pad * out_item)

    grid = (groups, N, n_tiles, n_k)

    out = pl.pallas_call(
        _grouped_matmul_kernel,
        out_shape=jax.ShapeDtypeStruct((N, groups, Cout_g, P_pad), out_dtype),
        grid_spec=pltpu.PrefetchScalarGridSpec(
            num_scalar_prefetch=0,
            grid=grid,
            in_specs=[
                # (N, groups, Kp, P_pad): lane-dense (tK, tP) block per step.
                pl.BlockSpec((1, 1, tK, tP), lambda g, n, p, k: (n, g, k, p)),
                # (groups, Cout_g, Kp): per-group (Cout_g, tK) weight block.
                # TODO(synk): for very large Cout_g*K, keep the group's weights
                # resident via a manual DMA into scratch instead of a
                # double-buffered BlockSpec input.
                pl.BlockSpec((1, Cout_g, tK), lambda g, n, p, k: (g, 0, k)),
            ],
            # (N, groups, Cout_g, P_pad): full-lane stores, written at last k.
            out_specs=pl.BlockSpec((1, 1, Cout_g, tP),
                                   lambda g, n, p, k: (n, g, 0, p)),
            scratch_shapes=[pltpu.VMEM((Cout_g, tP), jnp.float32)],
        ),
        compiler_params=pltpu.CompilerParams(
            dimension_semantics=("parallel", "parallel", "parallel",
                                 "arbitrary"),
            vmem_limit_bytes=vmem_limit),
        cost_estimate=pl.CostEstimate(flops=flops, transcendentals=0,
                                      bytes_accessed=bytes_accessed),
    )(x_col, w)

    # (N, groups, Cout_g, P_pad) -> (N, Cout, Do, Ho, Wo)  (pure reshape)
    out = out[..., :P].reshape(N, Cout, Do, Ho, Wo)
    return out


def _reference_conv3d(x_ncdhw, weight, *, stride=1, groups=1):
    pad = (weight.shape[2] - 1) // 2
    return jax.lax.conv_general_dilated(
        x_ncdhw, weight,
        window_strides=(stride, stride, stride),
        padding=[(pad, pad)] * 3,
        dimension_numbers=("NCDHW", "OIDHW", "NCDHW"),
        feature_group_count=groups,
    )


if __name__ == "__main__":
    key = jax.random.PRNGKey(0)
    kx, kw1, kw2, kx3, kw3 = jax.random.split(key, 5)

    # small, module-consistent shapes: batch=2, nIn=4, nOut=8, kSize=3, D=H=W=8
    N, nIn, nOut, kSize = 2, 4, 8, 3
    D = H = W = 8
    x = jax.random.normal(kx, (N, nIn, D, H, W), dtype=jnp.float32)

    fan_in = nIn * kSize ** 3
    bound = 1.0 / (fan_in ** 0.5)
    w1 = jax.random.uniform(kw1, (nOut, nIn, kSize, kSize, kSize),
                            minval=-bound, maxval=bound, dtype=jnp.float32)

    # 1) groups=1, stride=1
    out1 = jax.block_until_ready(conv3d_c(x, w1, stride=1, groups=1))
    ref1 = _reference_conv3d(x, w1, stride=1, groups=1)
    assert out1.shape == (N, nOut, D, H, W)
    assert jnp.allclose(out1, ref1, atol=2e-4, rtol=2e-4)

    # 2) groups=1, stride=2
    out1s = jax.block_until_ready(conv3d_c(x, w1, stride=2, groups=1))
    ref1s = _reference_conv3d(x, w1, stride=2, groups=1)
    assert out1s.shape == ref1s.shape
    assert jnp.allclose(out1s, ref1s, atol=2e-4, rtol=2e-4)

    # 3) groups=2
    groups = 2
    w2 = jax.random.uniform(kw2, (nOut, nIn // groups, kSize, kSize, kSize),
                            minval=-bound, maxval=bound, dtype=jnp.float32)
    out2 = jax.block_until_ready(conv3d_c(x, w2, stride=1, groups=groups))
    ref2 = _reference_conv3d(x, w2, stride=1, groups=groups)
    assert jnp.allclose(out2, ref2, atol=2e-4, rtol=2e-4)

    # 4) bf16 MXU path (cast happens before the im2col expansion), f32 accum
    out_bf = jax.block_until_ready(
        conv3d_c(x, w1, stride=1, groups=1, compute_dtype=jnp.bfloat16))
    rel_err = jnp.max(jnp.abs(out_bf - ref1)) / (jnp.max(jnp.abs(ref1)) + 1e-6)
    assert rel_err < 5e-2

    # 5) K-tiled accumulator path + forced >=2 spatial tiles (N=1, groups=1)
    nIn3, nOut3 = 8, 8
    x3 = jax.random.normal(kx3, (1, nIn3, D, H, W), dtype=jnp.float32)
    b3 = 1.0 / ((nIn3 * kSize ** 3) ** 0.5)
    w3 = jax.random.uniform(kw3, (nOut3, nIn3, kSize, kSize, kSize),
                            minval=-b3, maxval=b3, dtype=jnp.float32)
    out3 = jax.block_until_ready(
        conv3d_c(x3, w3, stride=1, groups=1, tile_k=128))   # K=216 -> 2 k-steps
    ref3 = _reference_conv3d(x3, w3, stride=1, groups=1)
    assert jnp.allclose(out3, ref3, atol=2e-4, rtol=2e-4)

    print("KERNEL_OK")
</pallas_src>

<mosaic_0001>
module attributes {stable_mosaic.version = 11 : i64} {
  func.func @_grouped_matmul_kernel(%arg0: i32, %arg1: i32, %arg2: i32, %arg3: i32, %arg4: memref<1x1x128x512xf32, #tpu.memory_space<vmem>>, %arg5: memref<1x8x128xf32, #tpu.memory_space<vmem>>, %arg6: memref<1x1x8x512xf32, #tpu.memory_space<vmem>>, %arg7: memref<8x512xf32, #tpu.memory_space<vmem>>) attributes {dimension_semantics = [#tpu.dimension_semantics<parallel>, #tpu.dimension_semantics<parallel>, #tpu.dimension_semantics<parallel>, #tpu.dimension_semantics<arbitrary>], iteration_bounds = array<i64: 1, 2, 1, 1>, scalar_prefetch = 0 : i64, scratch_operands = 1 : i64, tpu.core_type = #tpu.core_type<tc>, window_params = [{transform_indices = @transform_0, window_bounds = array<i64: 1, 1, 128, 512>}, {transform_indices = @transform_1, window_bounds = array<i64: 1, 8, 128>}, {transform_indices = @transform_2, window_bounds = array<i64: 1, 1, 8, 512>}]} {
    %c0_i32 = arith.constant 0 : i32
    %0 = arith.cmpi eq, %arg3, %c0_i32 : i32
    %1 = arith.extui %0 : i1 to i32
    %c0_i32_0 = arith.constant 0 : i32
    %2 = arith.cmpi ne, %1, %c0_i32_0 : i32
    scf.if %2 {
      %cst_13 = arith.constant 0.000000e+00 : f32
      %14 = vector.broadcast %cst_13 : f32 to vector<8x512xf32>
      %c0_14 = arith.constant 0 : index
      %c0_15 = arith.constant 0 : index
      %15 = vector.load %arg7[%c0_14, %c0_15] : memref<8x512xf32, #tpu.memory_space<vmem>>, vector<8x512xf32>
      tpu.vector_store %arg7[%c0_14, %c0_15], %14 {strides = array<i32>} : memref<8x512xf32, #tpu.memory_space<vmem>>, vector<8x512xf32>,
    } else {
    }
    %c0 = arith.constant 0 : index
    %c0_1 = arith.constant 0 : index
    %3 = vector.load %arg7[%c0, %c0_1] : memref<8x512xf32, #tpu.memory_space<vmem>>, vector<8x512xf32>
    %c0_2 = arith.constant 0 : index
    %c0_3 = arith.constant 0 : index
    %c0_4 = arith.constant 0 : index
    %4 = vector.load %arg5[%c0_2, %c0_3, %c0_4] : memref<1x8x128xf32, #tpu.memory_space<vmem>>, vector<1x8x128xf32>
    %5 = vector.shape_cast %4 : vector<1x8x128xf32> to vector<8x128xf32>
    %c0_5 = arith.constant 0 : index
    %c0_6 = arith.constant 0 : index
    %c0_7 = arith.constant 0 : index
    %c0_8 = arith.constant 0 : index
    %6 = vector.load %arg4[%c0_5, %c0_6, %c0_7, %c0_8] : memref<1x1x128x512xf32, #tpu.memory_space<vmem>>, vector<1x1x128x512xf32>
    %7 = vector.shape_cast %6 : vector<1x1x128x512xf32> to vector<128x512xf32>
    %cst = arith.constant dense<0.000000e+00> : vector<8x512xf32>
    %8 = tpu.matmul %5, %7, %cst {dimension_numbers = #tpu.dot_dimension_numbers<[1], [0], [0], [1], [0, 0, 1, 1], [], []>} : vector<8x128xf32>, vector<128x512xf32>, vector<8x512xf32> -> vector<8x512xf32>
    %9 = arith.addf %3, %8 : vector<8x512xf32>
    %c0_9 = arith.constant 0 : index
    %c0_10 = arith.constant 0 : index
    %10 = vector.load %arg7[%c0_9, %c0_10] : memref<8x512xf32, #tpu.memory_space<vmem>>, vector<8x512xf32>
    tpu.vector_store %arg7[%c0_9, %c0_10], %9 {strides = array<i32>} : memref<8x512xf32, #tpu.memory_space<vmem>>, vector<8x512xf32>,
    %c0_i32_11 = arith.constant 0 : i32
    %11 = arith.cmpi eq, %arg3, %c0_i32_11 : i32
    %12 = arith.extui %11 : i1 to i32
    %c0_i32_12 = arith.constant 0 : i32
    %13 = arith.cmpi ne, %12, %c0_i32_12 : i32
    scf.if %13 {
      %c0_13 = arith.constant 0 : index
      %c0_14 = arith.constant 0 : index
      %14 = vector.load %arg7[%c0_13, %c0_14] : memref<8x512xf32, #tpu.memory_space<vmem>>, vector<8x512xf32>
      %c0_15 = arith.constant 0 : index
      %c0_16 = arith.constant 0 : index
      %c0_17 = arith.constant 0 : index
      %c0_18 = arith.constant 0 : index
      %15 = vector.load %arg6[%c0_15, %c0_16, %c0_17, %c0_18] : memref<1x1x8x512xf32, #tpu.memory_space<vmem>>, vector<1x1x8x512xf32>
      %16 = vector.shape_cast %15 : vector<1x1x8x512xf32> to vector<8x512xf32>
      %17 = vector.shape_cast %14 : vector<8x512xf32> to vector<1x1x8x512xf32>
      tpu.vector_store %arg6[%c0_15, %c0_16, %c0_17, %c0_18], %17 {strides = array<i32>} : memref<1x1x8x512xf32, #tpu.memory_space<vmem>>, vector<1x1x8x512xf32>,
    } else {
    }
    return
  }
  func.func @transform_0(%arg0: i32, %arg1: i32, %arg2: i32, %arg3: i32) -> (i32, i32, i32, i32) {
    %c0_i32 = arith.constant 0 : i32
    return %arg1, %arg0, %arg3, %arg2 : i32, i32, i32, i32
  }
  func.func @transform_1(%arg0: i32, %arg1: i32, %arg2: i32, %arg3: i32) -> (i32, i32, i32) {
    %c0_i32 = arith.constant 0 : i32
    %c0_i32_0 = arith.constant 0 : i32
    return %arg0, %c0_i32, %arg3 : i32, i32, i32
  }
  func.func @transform_2(%arg0: i32, %arg1: i32, %arg2: i32, %arg3: i32) -> (i32, i32, i32, i32) {
    %c0_i32 = arith.constant 0 : i32
    %c0_i32_0 = arith.constant 0 : i32
    return %arg1, %arg0, %c0_i32, %arg2 : i32, i32, i32, i32
  }
}

</mosaic_0001>

<bundles_post_ra>
// kernel: tpu_custom_call.1
= control target key start
LH: loop header
LB: loop body
LE: loop exit
PB: predicated region body
PF: predicated region fallthrough
CT: control target
= control target key end

     0   :  { %7 = vsyncpa [#allocation4], 0  ;;  %s1019_s0 = inlined_call_operand.hbm [shape: f32[2,1,128,512], index: 0, kind: input, shape index: {}]   ;;  %s1020_s1 = inlined_call_operand.hbm [shape: f32[1,8,128], index: 1, kind: input, shape index: {}]   ;;  %s1021_s2 = inlined_call_operand.hbm [shape: f32[2,1,8,512], index: 2, kind: output, shape index: {}]  }
   0x1   :  { %9 = vsyncpa [#allocation4 + $0x1], 0 }
   0x2   :  { %10 = vsyncpa [#allocation7], 0 }
   0x3   :  { %11 = vsyncpa [#allocation5], 0 }
   0x4   :  { %13 = vsyncpa [#allocation5 + $0x1], 0  ;;  %s801_s9 = smov 0   ;;  %s803_s10 = smov 0  }
   0x5   :  { %s805_s11 = smov 0   ;;  %s807_s12 = smov 0  }
   0x6   :  { %s809_s13 = smov 0   ;;  %s811_s14 = smov 0  }
   0x7 LB: > { %s541_s15 = sadd.s32 4294967295, %s781_s14   ;;  %s542_s16 = sadd.s32 4294967294, %s781_s14   ;;  %s781_s14 = sphi %s811_s14, %s19_s14   ;;  %s777_s13 = sphi %s809_s13, %s1033_s13   ;;  %s773_s12 = sphi %s807_s12, %s1032_s12   ;;  %s769_s11 = sphi %s805_s11, %s1031_s11   ;;  %s765_s10 = sphi %s803_s10, %s1030_s10   ;;  %s761_s9 = sphi %s801_s9, %s1029_s9  }
   0x8   : > { %s58_s17 = sadd.s32 1, %s769_s11  ;;  %p65_p0 = scmp.ne.s32.totalorder %s769_s11, %s765_s10 }
   0x9   : > { %p66_p1 = scmp.eq.s32.totalorder %s781_s14, 0  ;;  %p71_p2 = scmp.ne.s32.totalorder %s765_s10, %s761_s9 }
   0xa   : > { %p839_p3 = scmp.eq.s32.totalorder %s541_s15, 0  ;;  %p127_p4 = scmp.eq.s32.totalorder %s541_s15, 1 }
   0xb   : > { %p843_p5 = por %p66_p1, %p65_p0  ;;  %p133_p6 = scmp.eq.s32.totalorder %s542_s16, 1 }
   0xc   : > { %p849_p7 = por %p839_p3, %p71_p2  ;;  %p853_p8 = por %p127_p4, %p65_p0 }
   0xd   : > { %p857_p9 = por %p133_p6, %p71_p2  ;;  %p543_p10 = scmp.ge.s32.totalorder %s781_s14, 1 }
   0xe   : > { %p140_p11 = scmp.lt.s32.totalorder %s781_s14, 3  ;;  %s155_s25 = sshll.u32 %s1020_s1, 4  ;;  %s156_s25 = int_to_ptr.hbm [resolvable:$true] %s155_s25 }
   0xf   : > { %s783_s27 = smov [#allocation6]   ;;  %p545_p13 = scmp.ge.s32.totalorder %s781_s14, 2 }
  0x10   : > { %p866_p12 = pnand %p543_p10, %p140_p11  ;;  %s157_s28 = sshll.u32 %s783_s27, 4  ;;  %s158_s28 = int_to_ptr.vmem [resolvable:$true] %s157_s28 }
  0x11   : > { %p581_p1 = scmp.lt.s32.totalorder %s781_s14, 2  ;;  %s41_s30 = sadd.s32 1, %s777_s13 }
  0x12   : > { %p568_p0 = pneg %p866_p12  ;;  %p43_p6 = scmp.ge.s32.totalorder %s41_s30, 2 }
  0x13   : > { %p878_p4 = pnand %p581_p1, %p843_p5  ;;  %s168_s3 = sand.u32 1, %s769_s11  }
  0x14   : > { %p569_p2 = pnand %p568_p0, %p839_p3  ;;  %s1035_s30 = smov (%p43_p6, %s41_s30), 0 }
  0x15   : > { %s546_s4 = sshll.u32 %s168_s3, 9  ;;  %s49_s5 = ssub.s32 %s777_s13, %s1035_s30 }
  0x16   : > { %571 = dma.hbm_to_vmem [thread:$0]  (!%p569_p2), %s156_s25, 128, %s158_s28, [#allocation7]  }
  0x17   : > { %p56_p10 = scmp.eq.s32.totalorder %s49_s5, 0  ;;  %s558_s6 = sshll.u32 %s777_s13, 9 }
  0x18   : > { %s184_s15 = scalar_lea.hbm %s1019_s0, %s558_s6  ;;  %s172_s16 = scalar_lea.vmem [#allocation3], %s546_s4 }
  0x19   : > { %s187_s19 = sshll.u32 %s172_s16, 4  ;;  %s185_s24 = sshll.u32 %s184_s15, 4  ;;  %s188_s19 = int_to_ptr.vmem [resolvable:$true] %s187_s19  ;;  %s186_s24 = int_to_ptr.hbm [resolvable:$true] %s185_s24 }
  0x1a   : > { %s895_s23 = scalar_select %p56_p10, %s769_s11, %s58_s17  }
  0x1b   : > { %s169_s25 = scalar_lea.sflag [#allocation4], %s168_s3  ;;  %s784_s27 = smov 512  }
  0x1c   : > { %s785_s28 = smov 32   ;;  %199 = sbr.rel (%p866_p12) target bundleno = 204 (0xcc), region = 28 }
  0x1d   : > { %575 = dma.hbm_to_vmem [thread:$0]  (!%p878_p4), %s186_s24, 8192, %s188_s19, %s169_s25, %s784_s27, %s784_s27, %s785_s28  }
  0x1e   : > { %s902_s5 = sand.u32 (!%p866_p12), 1, %s765_s10  }
  0x1f   : > { %s550_s4 = sshll.u32 (!%p866_p12), %s902_s5, 9  ;;  %s202_s17 = scalar_lea.sflag (!%p866_p12), [#allocation4], %s902_s5 }
  0x20   : > { %s906_s6 = scalar_lea.vmem (!%p866_p12), [#allocation3], %s550_s4 }
  0x21   : > { %748 = dma.done.wait (%p849_p7), %s202_s17, 8192  }
  0x22   : > { %750 = vsyncadd (%p849_p7), %s202_s17, 4294959104 }
  0x23   : > { %752 = dma.done.wait (%p839_p3), [#allocation7], 128  }
  0x24   : > { %754 = vsyncadd (%p839_p3), [#allocation7], 4294967168  ;;  %v310_v0 = vld [vmem:[%s906_s6 + $0x1f0] sm:$0xff]  ;;  %v311_v1 = vld [vmem:[%s906_s6 + $0x1f8] sm:$0xff]  ;;  %s552_s18 = sshll.u32 %s902_s5, 5  ;;  %s559_s20 = sshll.u32 %s773_s12, 5 }
  0x25   : > { %v306_v2 = vld [vmem:[%s906_s6 + $0x1d0] sm:$0xff]  ;;  %352 = vmatpush.msra.mxu2 %v310_v0  ;;  %372 = vmatpush.msra.mxu3 %v311_v1  ;;  %v307_v3 = vld [vmem:[%s906_s6 + $0x1d8] sm:$0xff]  ;;  %v308_v6 = vld [vmem:[%s906_s6 + $0x1e0] sm:$0xff]  ;;  %s427_s3 = scalar_lea.hbm %s1021_s2, %s559_s20  ;;  %s231_s7 = scalar_lea.vmem [#allocation8], %s552_s18 }
  0x26   : > { %v302_v4 = vld [vmem:[%s906_s6 + $0x1b0] sm:$0xff]  ;;  %v303_v5 = vld [vmem:[%s906_s6 + $0x1b8] sm:$0xff]  ;;  %v309_v7 = vld [vmem:[%s906_s6 + $0x1e8] sm:$0xff]  ;;  %312 = vmatpush.msra.mxu0 %v308_v6  ;;  %s429_s8 = sshll.u32 %s231_s7, 4  ;;  %s431_s15 = sshll.u32 %s427_s3, 4  ;;  %s430_s8 = int_to_ptr.vmem [resolvable:$true] %s429_s8  ;;  %s432_s15 = int_to_ptr.hbm [resolvable:$true] %s431_s15 }
  0x27   : > { %353 = vmatpush.msra.mxu2 %v306_v2  ;;  %373 = vmatpush.msra.mxu3 %v307_v3  ;;  %v304_v8 = vld [vmem:[%s906_s6 + $0x1c0] sm:$0xff]  ;;  %v305_v9 = vld [vmem:[%s906_s6 + $0x1c8] sm:$0xff]  ;;  %v298_v10 = vld [vmem:[%s906_s6 + $0x190] sm:$0xff]  ;;  %s412_s16 = scalar_lea.sflag [#allocation5], %s902_s5  ;;  %s709_s12 = sshra.s32 %s432_s15, 4  ;;  %s710_s12 = int_to_ptr.hbm [resolvable:$true] %s709_s12 }
  0x28   : > { %332 = vmatpush.msra.mxu1 %v309_v7  ;;  %v299_v11 = vld [vmem:[%s906_s6 + $0x198] sm:$0xff]  ;;  %v300_v12 = vld [vmem:[%s906_s6 + $0x1a0] sm:$0xff]  ;;  %v301_v13 = vld [vmem:[%s906_s6 + $0x1a8] sm:$0xff]  ;;  %313 = vmatpush.msra.mxu0 %v304_v8  ;;  %s711_s19 = scalar_lea.hbm %s710_s12, 32  ;;  %s715_s27 = scalar_lea.hbm %s1021_s2, 64 }
  0x29   : > { %354 = vmatpush.msra.mxu2 %v302_v4  ;;  %374 = vmatpush.msra.mxu3 %v303_v5  ;;  %v294_v14 = vld [vmem:[%s906_s6 + $0x170] sm:$0xff]  ;;  %v295_v15 = vld [vmem:[%s906_s6 + $0x178] sm:$0xff]  ;;  %v296_v16 = vld [vmem:[%s906_s6 + $0x180] sm:$0xff]  ;;  %p712_p3 = scmp.ne.s32.totalorder %s710_s12, %s711_s19  ;;  %p716_p11 = scmp.lt.s32.totalorder %s710_s12, %s1021_s2 }
  0x2a   : > { %333 = vmatpush.msra.mxu1 %v305_v9  ;;  %v297_v17 = vld [vmem:[%s906_s6 + $0x188] sm:$0xff]  ;;  %314 = vmatpush.msra.mxu0 %v300_v12  ;;  %v290_v18 = vld [vmem:[%s906_s6 + $0x150] sm:$0xff]  ;;  %v291_v19 = vld [vmem:[%s906_s6 + $0x158] sm:$0xff]  ;;  %p717_p12 = scmp.lt.s32.totalorder %s715_s27, %s711_s19 }
  0x2b   : > { %355 = vmatpush.msra.mxu2 %v298_v10  ;;  %375 = vmatpush.msra.mxu3 %v299_v11  ;;  %v292_v20 = vld [vmem:[%s906_s6 + $0x160] sm:$0xff]  ;;  %v293_v21 = vld [vmem:[%s906_s6 + $0x168] sm:$0xff]  ;;  %v286_v22 = vld [vmem:[%s906_s6 + $0x130] sm:$0xff]  ;;  %p713_p5 = pnand %p712_p3, %p853_p8 }
  0x2c   : > { %334 = vmatpush.msra.mxu1 %v301_v13  ;;  %315 = vmatpush.msra.mxu0 %v296_v16  ;;  %v287_v23 = vld [vmem:[%s906_s6 + $0x138] sm:$0xff]  ;;  %v288_v24 = vld [vmem:[%s906_s6 + $0x140] sm:$0xff]  ;;  %v289_v25 = vld [vmem:[%s906_s6 + $0x148] sm:$0xff]  ;;  %p718_p0 = por %p717_p12, %p716_p11 }
  0x2d   : > { %356 = vmatpush.msra.mxu2 %v294_v14  ;;  %376 = vmatpush.msra.mxu3 %v295_v15  ;;  %v282_v26 = vld [vmem:[%s906_s6 + $0x110] sm:$0xff]  ;;  %v283_v27 = vld [vmem:[%s906_s6 + $0x118] sm:$0xff]  ;;  %v284_v28 = vld [vmem:[%s906_s6 + $0x120] sm:$0xff]  ;;  %p714_p7 = pneg %p713_p5 }
  0x2e   : > { %335 = vmatpush.msra.mxu1 %v297_v17  ;;  %316 = vmatpush.msra.mxu0 %v292_v20  ;;  %v285_v29 = vld [vmem:[%s906_s6 + $0x128] sm:$0xff]  ;;  %v278_v30 = vld [vmem:[%s906_s6 + $0xf0] sm:$0xff]  ;;  %v279_v31 = vld [vmem:[%s906_s6 + $0xf8] sm:$0xff] }
  0x2f   : > { %357 = vmatpush.msra.mxu2 %v290_v18  ;;  %377 = vmatpush.msra.mxu3 %v291_v19  ;;  %v280_v32 = vld [vmem:[%s906_s6 + $0x100] sm:$0xff]  ;;  %v281_v33 = vld [vmem:[%s906_s6 + $0x108] sm:$0xff]  ;;  %v274_v34 = vld [vmem:[%s906_s6 + $0xd0] sm:$0xff]  ;;  %p719_p1 = pnand %p718_p0, %p714_p7 }
  0x30   : > { %336 = vmatpush.msra.mxu1 %v293_v21  ;;  %317 = vmatpush.msra.mxu0 %v288_v24  ;;  %v275_v35 = vld [vmem:[%s906_s6 + $0xd8] sm:$0xff]  ;;  %v276_v36 = vld [vmem:[%s906_s6 + $0xe0] sm:$0xff]  ;;  %v277_v37 = vld [vmem:[%s906_s6 + $0xe8] sm:$0xff] }
  0x31   : > { %358 = vmatpush.msra.mxu2 %v286_v22  ;;  %378 = vmatpush.msra.mxu3 %v287_v23  ;;  %v270_v38 = vld [vmem:[%s906_s6 + $0xb0] sm:$0xff]  ;;  %v271_v39 = vld [vmem:[%s906_s6 + $0xb8] sm:$0xff]  ;;  %v272_v40 = vld [vmem:[%s906_s6 + $0xc0] sm:$0xff] }
  0x32   : > { %337 = vmatpush.msra.mxu1 %v289_v25  ;;  %318 = vmatpush.msra.mxu0 %v284_v28  ;;  %v273_v41 = vld [vmem:[%s906_s6 + $0xc8] sm:$0xff]  ;;  %v266_v42 = vld [vmem:[%s906_s6 + $0x90] sm:$0xff]  ;;  %v267_v43 = vld [vmem:[%s906_s6 + $0x98] sm:$0xff] }
  0x33   : > { %359 = vmatpush.msra.mxu2 %v282_v26  ;;  %379 = vmatpush.msra.mxu3 %v283_v27  ;;  %v268_v44 = vld [vmem:[%s906_s6 + $0xa0] sm:$0xff]  ;;  %v269_v45 = vld [vmem:[%s906_s6 + $0xa8] sm:$0xff]  ;;  %v262_v46 = vld [vmem:[%s906_s6 + $0x70] sm:$0xff] }
  0x34   : > { %338 = vmatpush.msra.mxu1 %v285_v29  ;;  %319 = vmatpush.msra.mxu0 %v280_v32  ;;  %v263_v47 = vld [vmem:[%s906_s6 + $0x78] sm:$0xff]  ;;  %v264_v48 = vld [vmem:[%s906_s6 + $0x80] sm:$0xff]  ;;  %v265_v49 = vld [vmem:[%s906_s6 + $0x88] sm:$0xff] }
  0x35   : > { %360 = vmatpush.msra.mxu2 %v278_v30  ;;  %380 = vmatpush.msra.mxu3 %v279_v31  ;;  %v258_v50 = vld [vmem:[%s906_s6 + $0x50] sm:$0xff]  ;;  %v259_v51 = vld [vmem:[%s906_s6 + $0x58] sm:$0xff]  ;;  %v260_v52 = vld [vmem:[%s906_s6 + $0x60] sm:$0xff] }
  0x36   : > { %339 = vmatpush.msra.mxu1 %v281_v33  ;;  %320 = vmatpush.msra.mxu0 %v276_v36  ;;  %v261_v53 = vld [vmem:[%s906_s6 + $0x68] sm:$0xff]  ;;  %v254_v54 = vld [vmem:[%s906_s6 + $0x30] sm:$0xff]  ;;  %v255_v55 = vld [vmem:[%s906_s6 + $0x38] sm:$0xff] }
  0x37   : > { %361 = vmatpush.msra.mxu2 %v274_v34  ;;  %381 = vmatpush.msra.mxu3 %v275_v35  ;;  %v256_v56 = vld [vmem:[%s906_s6 + $0x40] sm:$0xff]  ;;  %v257_v57 = vld [vmem:[%s906_s6 + $0x48] sm:$0xff]  ;;  %v250_v58 = vld [vmem:[%s906_s6 + $0x10] sm:$0xff] }
  0x38   : > { %340 = vmatpush.msra.mxu1 %v277_v37  ;;  %321 = vmatpush.msra.mxu0 %v272_v40  ;;  %v251_v59 = vld [vmem:[%s906_s6 + $0x18] sm:$0xff]  ;;  %v247_v60 = vld [vmem:[#allocation6] sm:$0xff]  ;;  %v253_v62 = vld [vmem:[%s906_s6 + $0x28] sm:$0xff] }
  0x39   : > { %362 = vmatpush.msra.mxu2 %v270_v38  ;;  %382 = vmatpush.msra.mxu3 %v271_v39  ;;  %v252_v61 = vld [vmem:[%s906_s6 + $0x20] sm:$0xff]  ;;  %v249_v0 = vld [vmem:[%s906_s6 + $0x8] sm:$0xff] }
  0x3a   : > { %341 = vmatpush.msra.mxu1 %v273_v41  ;;  %322 = vmatpush.msra.mxu0 %v268_v44  ;;  %v248_v63 = vld [vmem:[%s906_s6] sm:$0xff] }
  0x3b   : > { %363 = vmatpush.msra.mxu2 %v266_v42  ;;  %383 = vmatpush.msra.mxu3 %v267_v43 }
  0x3c   : > { %342 = vmatpush.msra.mxu1 %v269_v45  ;;  %323 = vmatpush.msra.mxu0 %v264_v48 }
  0x3d   : > { %364 = vmatpush.msra.mxu2 %v262_v46  ;;  %384 = vmatpush.msra.mxu3 %v263_v47 }
  0x3e   : > { %343 = vmatpush.msra.mxu1 %v265_v49  ;;  %324 = vmatpush.msra.mxu0 %v260_v52 }
  0x3f   : > { %365 = vmatpush.msra.mxu2 %v258_v50  ;;  %385 = vmatpush.msra.mxu3 %v259_v51 }
  0x40   : > { %344 = vmatpush.msra.mxu1 %v261_v53  ;;  %325 = vmatpush.msra.mxu0 %v256_v56 }
  0x41   : > { %366 = vmatpush.msra.mxu2 %v254_v54  ;;  %386 = vmatpush.msra.mxu3 %v255_v55 }
  0x42   : > { %345 = vmatpush.msra.mxu1 %v257_v57  ;;  %326 = vmatpush.msra.mxu0 %v252_v61 }
  0x43   : > { %367 = vmatpush.msra.mxu2 %v250_v58  ;;  %387 = vmatpush.msra.mxu3 %v251_v59 }
  0x44   : > { %368 = vmatmul.f32.vlgmr.msra.gmra.mxu2 %v247_v60  ;;  %388 = vmatmul.f32.vlgmr.msra.gmra.mxu3 %v247_v60 }
  0x45   : > { %346 = vmatpush.msra.mxu1 %v253_v62  ;;  %327 = vmatpush.msra.mxu0 %v248_v63 }
  0x46   : > { %328 = vmatmul.f32.vlgmr.msra.gmra.mxu0 %v247_v60 }
  0x47   : > { %347 = vmatpush.msra.mxu1 %v249_v0 }
  0x48   : > { %348 = vmatmul.f32.vlgmr.msra.gmra.mxu1 %v247_v60 }
  0xc3   : > { %v329_v1 = vpop.f32.mrf.mxu0 }
  0xc4   : > { %407 = vst [vmem:[%s231_s7] sm:$0xff] %v329_v1 }
  0xc5   : > { %v349_v2 = vpop.f32.mrf.mxu1 }
  0xc6   : > { %408 = vst [vmem:[%s231_s7 + $0x8] sm:$0xff] %v349_v2 }
  0xc7   : > { %v369_v3 = vpop.f32.mrf.mxu2  ;;  %v389_v4 = vpop.f32.mrf.mxu3 }
  0xc8   : > { %409 = vst [vmem:[%s231_s7 + $0x10] sm:$0xff] %v369_v3 }
  0xc9   : > { %410 = vst [vmem:[%s231_s7 + $0x18] sm:$0xff] %v389_v4 }
  0xca   : > { %722 = shalt.err (!%p719_p1)
}
  0xcb   : > { %566 = dma.vmem_to_hbm [thread:$0]  (%p853_p8), %s430_s8, 512, %s432_s15, %s412_s16  }
  0xcc PF: > { %s443_s5 = sand.u32 1, %s761_s9   ;;  %p577_p2 = pnand %p545_p13, %p857_p9 }
  0xcd   : > { %s444_s17 = scalar_lea.sflag [#allocation5], %s443_s5 }
  0xce   : > { %p578_p4 = pneg %p577_p2 }
  0xd0   : > { %756 = dma.done.wait (%p578_p4), %s444_s17, 512  }
  0xd1   : > { %758 = vsyncadd (%p578_p4), %s444_s17, 4294966784  ;;  %s19_s14 = sadd.s32 1, %s781_s14   ;;  %s1029_s9 = smov %s765_s10 }
  0xd2   : > { %p16_p6 = scmp.ge.s32.totalorder %s19_s14, 4   ;;  %s1030_s10 = smov %s769_s11 }
  0xd3   : > { %s1031_s11 = smov %s895_s23  ;;  %s1032_s12 = smov %s777_s13 }
  0xd4   : > { %s1033_s13 = smov %s1035_s30  ;;  %18 = sbr.rel (!%p16_p6) target bundleno = 7 (0x7), region = 86 }
  0xd9   :  { %450 = vsyncpa [#allocation4], 1 }
  0xda   :  { %452 = vsyncpa [#allocation4 + $0x1], 1 }
  0xdb   :  { %453 = vsyncpa [#allocation7], 1 }
  0xdc   :  { %454 = vsyncpa [#allocation5], 1 }
  0xdd   :  { %456 = vsyncpa [#allocation5 + $0x1], 1 }

</bundles_post_ra>
